<compile_context>
chip_gen: v6e
topology: v6e:2x2x1
jax: 0.10.0
libtpu: 0.0.40
codegen_flags: <defaults>
</compile_context>

<pallas_src>
import functools

import jax
import jax.numpy as jnp
from jax import lax
from jax.experimental import pallas as pl
from jax.experimental.pallas import tpu as pltpu


def _round_up(x, m):
    return ((x + m - 1) // m) * m


def _choose_tiling(batch):
    """Row tile <= 512, multiple of 8, preferring >= 2 grid steps (v7x 2x TC)."""
    if batch <= 8:
        tile = 8
    elif batch <= 1024:
        tile = _round_up(pl.cdiv(batch, 2), 8)
    else:
        steps = pl.cdiv(batch, 512)
        tile = _round_up(pl.cdiv(batch, steps), 8)
    padded_batch = _round_up(batch, tile)
    return tile, padded_batch


def _mlp_layers(u, params, num_layers):
    """relu(linear) hidden layers + plain linear last layer.

    Matmul accumulates fp32; bias add / ReLU stay fp32.  If weights were cast
    to bf16 in the wrapper, only the dot operands are cast (v5e-safe).
    Note: default MXU precision for f32 operands is not bit-exact HIGHEST; it
    comfortably passes 1e-5 allclose at these scales.
    """
    for layer in range(num_layers):
        w = params[2 * layer]
        b = params[2 * layer + 1]
        u = jnp.dot(u.astype(w.dtype), w, preferred_element_type=jnp.float32) + b
        if layer < num_layers - 1:
            u = jnp.maximum(u, 0.0)  # ReLU on hidden layers only
    return u


def _forward_kernel(num_layers, x_ref, *refs):
    """refs = (w0, b0, ..., w_{L-1}, b_{L-1}, out_ref). Single forward pass."""
    out_ref = refs[-1]
    params = [r[...] for r in refs[:-1]]
    out_ref[...] = _mlp_layers(x_ref[...], params, num_layers).astype(out_ref.dtype)


def _euler_kernel(num_layers, num_steps, dt, x_ref, *refs):
    """Fused explicit-Euler integrator: u <- u + dt * net(u), num_steps times,
    all inside one kernel so parameters stay on-chip across steps."""
    out_ref = refs[-1]
    params = [r[...] for r in refs[:-1]]  # load weights/biases once

    def body(_, u):
        return u + dt * _mlp_layers(u, params, num_layers)

    out_ref[...] = lax.fori_loop(0, num_steps, body, x_ref[...]).astype(out_ref.dtype)


def _run(kernel, u, weights, biases, out_dim):
    batch, x_dim = u.shape
    tile, padded_batch = _choose_tiling(batch)
    if padded_batch != batch:  # ragged batch: pad rows (zeros), slice off after
        u = jnp.pad(u, ((0, padded_batch - batch), (0, 0)))

    # Input block: real (unpadded) feature width; block == full array dim is legal.
    in_specs = [pl.BlockSpec((tile, x_dim), lambda i: (i, 0))]
    args = [u]
    for w, b in zip(weights, biases):
        # Parameters are tiny; full constant-index blocks stay VMEM-resident
        # across all grid steps.
        in_specs.append(pl.BlockSpec(w.shape, lambda i: (0, 0)))
        in_specs.append(pl.BlockSpec(b.shape, lambda i: (0, 0)))
        args.append(w)
        args.append(b)

    # Output written at its real width (out_dim); a narrow store is cheaper than
    # a separate XLA slice that would re-read/re-write the whole output from HBM.
    out_specs = pl.BlockSpec((tile, out_dim), lambda i: (i, 0))

    out = pl.pallas_call(
        kernel,
        out_shape=jax.ShapeDtypeStruct((padded_batch, out_dim), jnp.float32),
        grid_spec=pltpu.PrefetchScalarGridSpec(
            num_scalar_prefetch=0,
            grid=(padded_batch // tile,),
            in_specs=in_specs,
            out_specs=out_specs,
        ),
        compiler_params=pltpu.CompilerParams(
            dimension_semantics=("parallel",)
        ),
    )(*args)
    return out[:batch] if padded_batch != batch else out


def ode_net_forward(t, u, weights, biases, *, use_bf16=False):
    """Pallas implementation of ODE_Net.forward(t, u). t is ignored (as in PyTorch)."""
    del t  # unused in the reference forward
    if use_bf16:  # halve HBM bytes for the dominant streams (v6e/v7x)
        u = u.astype(jnp.bfloat16)
        weights = [w.astype(jnp.bfloat16) for w in weights]
    num_layers = len(weights)
    out_dim = weights[-1].shape[1]
    kernel = functools.partial(_forward_kernel, num_layers)
    return _run(kernel, u, weights, biases, out_dim)


def ode_net_euler(u0, weights, biases, *, num_steps, dt, use_bf16=False):
    """num_steps explicit-Euler steps of du/dt = ODE_Net(t, u) in ONE pallas_call."""
    x_dim = u0.shape[1]
    out_dim = weights[-1].shape[1]
    assert x_dim == out_dim, "Euler integration requires out_dim == x_dim"
    if use_bf16:
        weights = [w.astype(jnp.bfloat16) for w in weights]
    # TODO(synk): for RK4 or adaptive solvers, add the extra stage evaluations
    # inside the same kernel body (same VMEM-resident parameters).
    kernel = functools.partial(_euler_kernel, len(weights), num_steps, float(dt))
    return _run(kernel, u0, weights, biases, out_dim)


def init_params(key, hidden_layer_widths):
    """Deterministic init mimicking nn.Linear's U(-1/sqrt(fan_in), 1/sqrt(fan_in))."""
    weights, biases = [], []
    num_layers = len(hidden_layer_widths) - 1
    for i in range(num_layers):
        fan_in = hidden_layer_widths[i]
        fan_out = hidden_layer_widths[i + 1]
        key, kw, kb = jax.random.split(key, 3)
        bound = 1.0 / jnp.sqrt(jnp.float32(fan_in))
        # Stored as [in, out] = W.T relative to PyTorch's [out, in].
        w = jax.random.uniform(kw, (fan_in, fan_out), jnp.float32, -bound, bound)
        b = jax.random.uniform(kb, (1, fan_out), jnp.float32, -bound, bound)
        weights.append(w)
        biases.append(b)
    return weights, biases


def reference_forward(u, weights, biases):
    for w, b in zip(weights[:-1], biases[:-1]):
        u = jax.nn.relu(u @ w + b)
    return u @ weights[-1] + biases[-1]


if __name__ == "__main__":
    # hidden_layer_widths = [x_dim, h1, h2, out_dim] -> 2 hidden (ReLU) layers + 1 linear
    hidden_layer_widths = [16, 32, 32, 16]
    batch = 64

    key = jax.random.PRNGKey(0)
    key, ku = jax.random.split(key)
    u = jax.random.normal(ku, (batch, hidden_layer_widths[0]), jnp.float32)
    t = jnp.float32(0.0)  # unused by the forward pass, kept for signature parity

    weights, biases = init_params(key, hidden_layer_widths)

    # Single forward pass (matches ODE_Net.forward).
    out = jax.block_until_ready(ode_net_forward(t, u, weights, biases))
    ref = reference_forward(u, weights, biases)
    assert out.shape == (batch, hidden_layer_widths[-1])
    assert jnp.allclose(out, ref, atol=1e-5, rtol=1e-5)

    # Fused multi-step integrator path (top perf-review item): 8 Euler steps
    # of du/dt = net(u) in a single pallas_call, weights VMEM-resident.
    num_steps, dt = 8, 0.05
    out_euler = jax.block_until_ready(
        ode_net_euler(u, weights, biases, num_steps=num_steps, dt=dt))
    ref_euler = u
    for _ in range(num_steps):
        ref_euler = ref_euler + dt * reference_forward(ref_euler, weights, biases)
    assert out_euler.shape == ref_euler.shape
    assert jnp.allclose(out_euler, ref_euler, atol=1e-4, rtol=1e-4)

    print("KERNEL_OK")
</pallas_src>

<mosaic_0001>
module attributes {stable_mosaic.version = 11 : i64} {
  func.func @_forward_kernel(%arg0: i32, %arg1: memref<32x16xf32, #tpu.memory_space<vmem>>, %arg2: memref<16x32xf32, #tpu.memory_space<vmem>>, %arg3: memref<1x32xf32, #tpu.memory_space<vmem>>, %arg4: memref<32x32xf32, #tpu.memory_space<vmem>>, %arg5: memref<1x32xf32, #tpu.memory_space<vmem>>, %arg6: memref<32x16xf32, #tpu.memory_space<vmem>>, %arg7: memref<1x16xf32, #tpu.memory_space<vmem>>, %arg8: memref<32x16xf32, #tpu.memory_space<vmem>>) attributes {dimension_semantics = [#tpu.dimension_semantics<parallel>], iteration_bounds = array<i64: 2>, scalar_prefetch = 0 : i64, scratch_operands = 0 : i64, tpu.core_type = #tpu.core_type<tc>, window_params = [{transform_indices = @transform_0, window_bounds = array<i64: 32, 16>}, {pipeline_mode = #tpu.pipeline_mode<synchronous>, transform_indices = @transform_1, window_bounds = array<i64: 16, 32>}, {pipeline_mode = #tpu.pipeline_mode<synchronous>, transform_indices = @transform_2, window_bounds = array<i64: 1, 32>}, {pipeline_mode = #tpu.pipeline_mode<synchronous>, transform_indices = @transform_3, window_bounds = array<i64: 32, 32>}, {pipeline_mode = #tpu.pipeline_mode<synchronous>, transform_indices = @transform_4, window_bounds = array<i64: 1, 32>}, {pipeline_mode = #tpu.pipeline_mode<synchronous>, transform_indices = @transform_5, window_bounds = array<i64: 32, 16>}, {pipeline_mode = #tpu.pipeline_mode<synchronous>, transform_indices = @transform_6, window_bounds = array<i64: 1, 16>}, {transform_indices = @transform_7, window_bounds = array<i64: 32, 16>}]} {
    %c0 = arith.constant 0 : index
    %c0_0 = arith.constant 0 : index
    %0 = vector.load %arg2[%c0, %c0_0] : memref<16x32xf32, #tpu.memory_space<vmem>>, vector<16x32xf32>
    %c0_1 = arith.constant 0 : index
    %c0_2 = arith.constant 0 : index
    %1 = vector.load %arg3[%c0_1, %c0_2] : memref<1x32xf32, #tpu.memory_space<vmem>>, vector<1x32xf32>
    %c0_3 = arith.constant 0 : index
    %c0_4 = arith.constant 0 : index
    %2 = vector.load %arg4[%c0_3, %c0_4] : memref<32x32xf32, #tpu.memory_space<vmem>>, vector<32x32xf32>
    %c0_5 = arith.constant 0 : index
    %c0_6 = arith.constant 0 : index
    %3 = vector.load %arg5[%c0_5, %c0_6] : memref<1x32xf32, #tpu.memory_space<vmem>>, vector<1x32xf32>
    %c0_7 = arith.constant 0 : index
    %c0_8 = arith.constant 0 : index
    %4 = vector.load %arg6[%c0_7, %c0_8] : memref<32x16xf32, #tpu.memory_space<vmem>>, vector<32x16xf32>
    %c0_9 = arith.constant 0 : index
    %c0_10 = arith.constant 0 : index
    %5 = vector.load %arg7[%c0_9, %c0_10] : memref<1x16xf32, #tpu.memory_space<vmem>>, vector<1x16xf32>
    %c0_11 = arith.constant 0 : index
    %c0_12 = arith.constant 0 : index
    %6 = vector.load %arg1[%c0_11, %c0_12] : memref<32x16xf32, #tpu.memory_space<vmem>>, vector<32x16xf32>
    %cst = arith.constant dense<0.000000e+00> : vector<32x32xf32>
    %7 = tpu.matmul %6, %0, %cst {dimension_numbers = #tpu.dot_dimension_numbers<[1], [0], [0], [1], [0, 0, 1, 1], [], []>} : vector<32x16xf32>, vector<16x32xf32>, vector<32x32xf32> -> vector<32x32xf32>
    %8 = vector.broadcast %1 : vector<1x32xf32> to vector<32x32xf32>
    %9 = arith.addf %7, %8 : vector<32x32xf32>
    %cst_13 = arith.constant 0.000000e+00 : f32
    %10 = vector.broadcast %cst_13 : f32 to vector<32x32xf32>
    %11 = arith.maximumf %9, %10 : vector<32x32xf32>
    %cst_14 = arith.constant dense<0.000000e+00> : vector<32x32xf32>
    %12 = tpu.matmul %11, %2, %cst_14 {dimension_numbers = #tpu.dot_dimension_numbers<[1], [0], [0], [1], [0, 0, 1, 1], [], []>} : vector<32x32xf32>, vector<32x32xf32>, vector<32x32xf32> -> vector<32x32xf32>
    %13 = vector.broadcast %3 : vector<1x32xf32> to vector<32x32xf32>
    %14 = arith.addf %12, %13 : vector<32x32xf32>
    %cst_15 = arith.constant 0.000000e+00 : f32
    %15 = vector.broadcast %cst_15 : f32 to vector<32x32xf32>
    %16 = arith.maximumf %14, %15 : vector<32x32xf32>
    %cst_16 = arith.constant dense<0.000000e+00> : vector<32x16xf32>
    %17 = tpu.matmul %16, %4, %cst_16 {dimension_numbers = #tpu.dot_dimension_numbers<[1], [0], [0], [1], [0, 0, 1, 1], [], []>} : vector<32x32xf32>, vector<32x16xf32>, vector<32x16xf32> -> vector<32x16xf32>
    %18 = vector.broadcast %5 : vector<1x16xf32> to vector<32x16xf32>
    %19 = arith.addf %17, %18 : vector<32x16xf32>
    %c0_17 = arith.constant 0 : index
    %c0_18 = arith.constant 0 : index
    %20 = vector.load %arg8[%c0_17, %c0_18] : memref<32x16xf32, #tpu.memory_space<vmem>>, vector<32x16xf32>
    tpu.vector_store %arg8[%c0_17, %c0_18], %19 {strides = array<i32>} : memref<32x16xf32, #tpu.memory_space<vmem>>, vector<32x16xf32>,
    return
  }
  func.func @transform_0(%arg0: i32) -> (i32, i32) {
    %c0_i32 = arith.constant 0 : i32
    %c0_i32_0 = arith.constant 0 : i32
    return %arg0, %c0_i32 : i32, i32
  }
  func.func @transform_1(%arg0: i32) -> (i32, i32) {
    %c0_i32 = arith.constant 0 : i32
    %c0_i32_0 = arith.constant 0 : i32
    %c0_i32_1 = arith.constant 0 : i32
    return %c0_i32, %c0_i32_0 : i32, i32
  }
  func.func @transform_2(%arg0: i32) -> (i32, i32) {
    %c0_i32 = arith.constant 0 : i32
    %c0_i32_0 = arith.constant 0 : i32
    %c0_i32_1 = arith.constant 0 : i32
    return %c0_i32, %c0_i32_0 : i32, i32
  }
  func.func @transform_3(%arg0: i32) -> (i32, i32) {
    %c0_i32 = arith.constant 0 : i32
    %c0_i32_0 = arith.constant 0 : i32
    %c0_i32_1 = arith.constant 0 : i32
    return %c0_i32, %c0_i32_0 : i32, i32
  }
  func.func @transform_4(%arg0: i32) -> (i32, i32) {
    %c0_i32 = arith.constant 0 : i32
    %c0_i32_0 = arith.constant 0 : i32
    %c0_i32_1 = arith.constant 0 : i32
    return %c0_i32, %c0_i32_0 : i32, i32
  }
  func.func @transform_5(%arg0: i32) -> (i32, i32) {
    %c0_i32 = arith.constant 0 : i32
    %c0_i32_0 = arith.constant 0 : i32
    %c0_i32_1 = arith.constant 0 : i32
    return %c0_i32, %c0_i32_0 : i32, i32
  }
  func.func @transform_6(%arg0: i32) -> (i32, i32) {
    %c0_i32 = arith.constant 0 : i32
    %c0_i32_0 = arith.constant 0 : i32
    %c0_i32_1 = arith.constant 0 : i32
    return %c0_i32, %c0_i32_0 : i32, i32
  }
  func.func @transform_7(%arg0: i32) -> (i32, i32) {
    %c0_i32 = arith.constant 0 : i32
    %c0_i32_0 = arith.constant 0 : i32
    return %arg0, %c0_i32 : i32, i32
  }
}

</mosaic_0001>

<bundles_post_ra>
// kernel: tpu_custom_call.1
= control target key start
LH: loop header
LB: loop body
LE: loop exit
PB: predicated region body
PF: predicated region fallthrough
CT: control target
= control target key end

     0   :  { %s820_s24 = smov 0   ;;  %s899_s0 = inlined_call_operand.vmem [shape: f32[64,16], index: 0, kind: input, shape index: {}]   ;;  %s900_s1 = inlined_call_operand.vmem [shape: f32[16,32], index: 1, kind: input, shape index: {}]   ;;  %s901_s2 = inlined_call_operand.vmem [shape: f32[1,32], index: 2, kind: input, shape index: {}]   ;;  %s902_s3 = inlined_call_operand.vmem [shape: f32[32,32], index: 3, kind: input, shape index: {}]   ;;  %s903_s4 = inlined_call_operand.vmem [shape: f32[1,32], index: 4, kind: input, shape index: {}]   ;;  %s904_s5 = inlined_call_operand.vmem [shape: f32[32,16], index: 5, kind: input, shape index: {}]   ;;  %s905_s6 = inlined_call_operand.vmem [shape: f32[1,16], index: 6, kind: input, shape index: {}]   ;;  %s906_s7 = inlined_call_operand.vmem [shape: f32[64,16], index: 7, kind: output, shape index: {}]  }
   0x1 LB: > { %s678_s25 = sadd.s32 4294967295, %s778_s24   ;;  %p682_p0 = scmp.ge.s32.totalorder %s778_s24, 1  ;;  %s778_s24 = sphi %s820_s24, %s17_s24  }
   0x2   : > { %p238_p1 = scmp.lt.s32.totalorder %s778_s24, 3 }
   0x4   : > { %p239_p2 = pnand %p682_p0, %p238_p1 }
   0x5   : > { %s683_s30 = sshll.u32 (!%p239_p2), %s678_s25, 2 }
   0x6   : > { %242 = sbr.rel (%p239_p2) target bundleno = 618 (0x26a), region = 48  ;;  %p271_p3 = scmp.lt.s32.totalorder (!%p239_p2), %s683_s30, 7 }
   0xb   : > { %v283_v0 = vld [vmem:[%s900_s1 + $0x8] sm:$0xff]  ;;  %v282_v1 = vld [vmem:[%s900_s1] sm:$0xff]  ;;  %s908_s30 = smov (!%p271_p3, %s683_s30), 7  ;;  %vm305_vm0 = vcmask 130048   ;;  %v288_v6 = vld [vmem:[%s902_s3 + $0x18] sm:$0xff]  ;;  %vm413_vm1 = vcmask 261120  }
   0xc   : > { %726 = vmatprep.subr.mxu0 %v283_v0  ;;  %s684_s8 = sshll.u32 %s908_s30, 3  ;;  %736 = vmatprep.subr.mxu1 %v288_v6  ;;  %v287_v7 = vld [vmem:[%s902_s3 + $0x10] sm:$0xff]  ;;  %v286_v8 = vld [vmem:[%s902_s3 + $0x8] sm:$0xff]  ;;  %v285_v9 = vld [vmem:[%s902_s3] sm:$0xff] }
   0xd   : > { %727 = vmatpush3.msra.mxu0 %v283_v0  ;;  %s274_s11 = scalar_lea.vmem %s899_s0, %s684_s8  ;;  %737 = vmatpush3.msra.mxu1 %v288_v6  ;;  %v293_v10 = vld [vmem:[%s904_s5 + $0x18] sm:$0xff]  ;;  %v687_v11 = vld [vmem:[%s901_s2] ss:$0 sm:$0xff]  ;;  %v292_v24 = vld [vmem:[%s904_s5 + $0x10] sm:$0xff]  ;;  %s280_s16 = scalar_lea.vmem %s906_s7, %s684_s8 }
   0xe   : > { %728 = vmatprep.subr.mxu0 %v282_v1  ;;  %v295_v2 = vld [vmem:[%s274_s11] sm:$0xff]  ;;  %v296_v3 = vld [vmem:[%s274_s11 + $0x8] sm:$0xff]  ;;  %v297_v4 = vld [vmem:[%s274_s11 + $0x10] sm:$0xff]  ;;  %738 = vmatprep.subr.mxu1 %v287_v7 }
   0xf   : > { %729 = vmatpush3.msra.mxu0 %v282_v1  ;;  %730 = vmatprep.mubr.msk.f32.mxu0 %vm305_vm0, %v295_v2  ;;  %v298_v5 = vld [vmem:[%s274_s11 + $0x18] sm:$0xff]  ;;  %v291_v25 = vld [vmem:[%s904_s5 + $0x8] sm:$0xff]  ;;  %v290_v26 = vld [vmem:[%s904_s5] sm:$0xff] }
  0x10   : > { %731 = vmatmul.mubr.msk.f32.vlgmr.msra.gmra.mxu0 %vm305_vm0, %v296_v3  ;;  %739 = vmatpush3.msra.mxu1 %v287_v7  ;;  %v692_v27 = vld [vmem:[%s903_s4] ss:$0 sm:$0xff] }
  0x11   : > { %733 = vmatprep.mubr.msk.f32.mxu0 %vm305_vm0, %v297_v4  ;;  %740 = vmatprep.subr.mxu1 %v286_v8  ;;  %v697_v41 = vld [vmem:[%s905_s6] ss:$0 sm:$0xff] }
  0x12   : > { %741 = vmatpush3.msra.mxu1 %v286_v8  ;;  %750 = vmatprep.subr.mxu0 %v293_v10 }
  0x13   : > { %742 = vmatprep.subr.mxu1 %v285_v9  ;;  %751 = vmatpush3.msra.mxu0 %v293_v10 }
  0x14   : > { %734 = vmatmul.mubr.msk.f32.gmra.mxu0 %vm305_vm0, %v298_v5  ;;  %743 = vmatpush3.msra.mxu1 %v285_v9 }
  0x15   : > { %752 = vmatprep.subr.mxu0 %v292_v24 }
  0x16   : > { %753 = vmatpush3.msra.mxu0 %v292_v24 }
  0x17   : > { %754 = vmatprep.subr.mxu0 %v291_v25 }
  0x18   : > { %755 = vmatpush3.msra.mxu0 %v291_v25 }
  0x19   : > { %756 = vmatprep.subr.mxu0 %v290_v26 }
  0x1a   : > { %757 = vmatpush3.msra.mxu0 %v290_v26 }
  0xd0   : > { %v732_v12 = vpop.f32.mrf.mxu0 }
  0xd1   : > { %v390_v13 = vadd.f32 %v732_v12, %v687_v11 }
  0xd2   : > { %v384_v14 = vpop.f32.mrf.mxu0 }
  0xd3   : > { %v385_v15 = vadd.f32 %v687_v11, %v384_v14  ;;  %v404_v18 = vmax.f32 %v390_v13, 0.0 }
  0xd4   : > { %v735_v16 = vpop.f32.mrf.mxu0 }
  0xd5   : > { %v403_v17 = vmax.f32 %v385_v15, 0.0  ;;  %v400_v19 = vadd.f32 %v735_v16, %v687_v11 }
  0xd6   : > { %v394_v20 = vpop.f32.mrf.mxu0 }
  0xd7   : > { %v395_v21 = vadd.f32 %v687_v11, %v394_v20  ;;  %744 = vmatprep.mubr.msk.f32.mxu1 %vm413_vm1, %v403_v17  ;;  %v406_v23 = vmax.f32 %v400_v19, 0.0 }
  0xd8   : > { %745 = vmatmul.mubr.msk.f32.vlgmr.msra.gmra.mxu1 %vm413_vm1, %v404_v18 }
  0xd9   : > { %v405_v22 = vmax.f32 %v395_v21, 0.0 }
  0xdb   : > { %747 = vmatprep.mubr.msk.f32.mxu1 %vm413_vm1, %v405_v22 }
  0xdc   : > { %748 = vmatmul.mubr.msk.f32.gmra.mxu1 %vm413_vm1, %v406_v23 }
 0x198   : > { %v746_v28 = vpop.f32.mrf.mxu1 }
 0x199   : > { %v498_v29 = vadd.f32 %v746_v28, %v692_v27 }
 0x19a   : > { %v492_v30 = vpop.f32.mrf.mxu1 }
 0x19b   : > { %v493_v31 = vadd.f32 %v692_v27, %v492_v30  ;;  %v512_v34 = vmax.f32 %v498_v29, 0.0 }
 0x19c   : > { %v749_v32 = vpop.f32.mrf.mxu1 }
 0x19d   : > { %v511_v33 = vmax.f32 %v493_v31, 0.0  ;;  %v508_v35 = vadd.f32 %v749_v32, %v692_v27 }
 0x19e   : > { %v502_v36 = vpop.f32.mrf.mxu1 }
 0x19f   : > { %v503_v37 = vadd.f32 %v692_v27, %v502_v36  ;;  %758 = vmatprep.mubr.msk.f32.mxu0 %vm413_vm1, %v511_v33  ;;  %v514_v39 = vmax.f32 %v508_v35, 0.0 }
 0x1a0   : > { %759 = vmatmul.mubr.msk.f32.vlgmr.msra.gmra.mxu0 %vm413_vm1, %v512_v34 }
 0x1a1   : > { %v513_v38 = vmax.f32 %v503_v37, 0.0 }
 0x1a3   : > { %761 = vmatprep.mubr.msk.f32.mxu0 %vm413_vm1, %v513_v38 }
 0x1a4   : > { %762 = vmatmul.mubr.msk.f32.gmra.mxu0 %vm413_vm1, %v514_v39 }
 0x260   : > { %v760_v40 = vpop.f32.mrf.mxu0 }
 0x261   : > { %v605_v44 = vadd.f32 %v760_v40, %v697_v41 }
 0x262   : > { %v599_v42 = vpop.f32.mrf.mxu0 }
 0x263   : > { %v600_v43 = vadd.f32 %v697_v41, %v599_v42  ;;  %619 = vst.msk [vmem:[%s280_s16 + $0x8] sm:$0xff] %vm305_vm0, %v605_v44 }
 0x264   : > { %v763_v45 = vpop.f32.mrf.mxu0 }
 0x265   : > { %618 = vst.msk [vmem:[%s280_s16] sm:$0xff] %vm305_vm0, %v600_v43  ;;  %v615_v48 = vadd.f32 %v763_v45, %v697_v41 }
 0x266   : > { %v609_v46 = vpop.f32.mrf.mxu0 }
 0x267   : > { %v610_v47 = vadd.f32 %v697_v41, %v609_v46  ;;  %621 = vst.msk [vmem:[%s280_s16 + $0x18] sm:$0xff] %vm305_vm0, %v615_v48 }
 0x269   : > { %620 = vst.msk [vmem:[%s280_s16 + $0x10] sm:$0xff] %vm305_vm0, %v610_v47 }
 0x26a PF: > { %s17_s24 = sadd.s32 1, %s778_s24  }
 0x26b   : > { %p14_p4 = scmp.ge.s32.totalorder %s17_s24, 4  }
 0x26d   :  { %16 = sbr.rel (!%p14_p4) target bundleno = 1 (0x1), region = 78 }

</bundles_post_ra>
